<compile_context>
chip_gen: v7x
topology: tpu7x:2x2x1
jax: 0.10.0
libtpu: 0.0.40
codegen_flags: <defaults>
</compile_context>

<pallas_src>
import functools

import jax
import jax.numpy as jnp
from jax import lax
from jax.experimental import pallas as pl
from jax.experimental.pallas import tpu as pltpu


# ----------------------------------------------------------------------------
# Fused kernel: AttDoubleConv2d for one batch element (transposed layout)
# ----------------------------------------------------------------------------

def _att_double_conv_kernel(pat_ref, wA_ref, sA_ref, tA_ref, md1_ref, mout_ref,
                            w2_ref, s2_ref, t2_ref, wa2_ref, ba2_ref, *rest,
                            H, W, Cout, Np, se):
    """Fused AttDoubleConv2d for one image.

    pat_ref : (1, 9*Cin, Np) bf16  host-built im2col patches on the extended
                                   (H+2, W+2) domain; flat spatial on lanes
    wA_ref  : (2*Cout, 9*Cin) bf16 merged [dc1 | att1] weights
    sA/tA   : (2*Cout, 1) f32      per-channel affine (BN fold / conv bias)
    md1_ref : (1, Np) f32          1 on the zero-padded-d1 support, else 0
    mout_ref: (1, Np) f32          1 on valid output pixels (SE mean), else 0
    w2_ref  : (9*Cout, Cout) bf16  dc2 weights, one (Cout, Cout) slab per tap
    s2/t2   : (Cout, 1) f32        BN2 fold (dc2 bias folded in)
    wa2/ba2 : (Cout, Cout) bf16 / (Cout, 1) f32   attention 1x1 conv
    rest    : [wse1, bse1, wse2, bse2,] o_ref     (SE params present iff se)
    o_ref   : (1, Cout, Np)        lane-dense output slab
    """
    if se:
        wse1_ref, bse1_ref, wse2_ref, bse2_ref, o_ref = rest
    else:
        (o_ref,) = rest

    We = W + 2

    # ---- merged dc1/att1 conv: one transposed GEMM, spatial fills N (>=256)
    z = jnp.dot(wA_ref[...], pat_ref[0],
                preferred_element_type=jnp.float32)           # (2*Cout, Np)
    z = jnp.maximum(z * sA_ref[...] + tA_ref[...], 0.0)       # affine + ReLU

    # dc1 branch: masking the extended border == zero padding for conv2
    d1 = z[:Cout] * md1_ref[...]                               # (Cout, Np)
    a1 = z[Cout:]                                              # (Cout, Np)

    # ---- attention tail: align to the output pixel grid, then 1x1 conv -----
    a1s = pltpu.roll(a1, shift=Np - (We + 1), axis=1)          # XLU lane rotate
    a2 = jax.nn.sigmoid(
        jnp.dot(wa2_ref[...], a1s.astype(jnp.bfloat16),
                preferred_element_type=jnp.float32)
        + ba2_ref[...]) + 1.0                                  # (Cout, Np)

    # ---- dc2 conv: 9 per-tap matmuls; tap shifts via XLU lane rolls --------
    acc = jnp.zeros((Cout, Np), jnp.float32)
    for kh in range(3):
        for kw in range(3):
            s = kh * We + kw
            tap = kh * 3 + kw
            shifted = d1 if s == 0 else pltpu.roll(d1, shift=Np - s, axis=1)
            acc = acc + jnp.dot(w2_ref[tap * Cout:(tap + 1) * Cout, :],
                                shifted.astype(jnp.bfloat16),
                                preferred_element_type=jnp.float32)
    d2 = jnp.maximum(acc * s2_ref[...] + t2_ref[...], 0.0)     # (Cout, Np)

    y = d2 * a2

    # ---- SE block (matmuls are <=16x16x1; bf16 operands, f32 accumulate) ---
    if se:
        m = jnp.sum(y * mout_ref[...], axis=1, keepdims=True) * (1.0 / (H * W))
        h = jnp.maximum(
            jnp.dot(wse1_ref[...], m.astype(jnp.bfloat16),
                    preferred_element_type=jnp.float32) + bse1_ref[...], 0.0)
        gate = jax.nn.sigmoid(
            jnp.dot(wse2_ref[...], h.astype(jnp.bfloat16),
                    preferred_element_type=jnp.float32) + bse2_ref[...])
        y = y * gate

    o_ref[...] = y.reshape(1, Cout, Np).astype(o_ref.dtype)


# ----------------------------------------------------------------------------
# Wrapper (host-side im2col, weight prep, BlockSpecs)
# ----------------------------------------------------------------------------

def _w3x3_rows(w):
    """torch (Cout, Cin, 3, 3) -> (Cout, 9*Cin), K ordered (kh, kw, cin)."""
    co, ci = w.shape[0], w.shape[1]
    return jnp.transpose(w, (0, 2, 3, 1)).reshape(co, 9 * ci)


def _im2col_patches(x_nchw, Np):
    """(B, Cin, H, W) -> bf16 (B, 9*Cin, Np) extended-domain im2col patches."""
    B, Cin, H, W = x_nchw.shape
    He, We = H + 2, W + 2
    xp = jnp.pad(x_nchw, ((0, 0), (0, 0), (2, 2), (2, 2)))
    slabs = [xp[:, :, kh:kh + He, kw:kw + We]
             for kh in range(3) for kw in range(3)]
    pat = jnp.stack(slabs, axis=1).reshape(B, 9 * Cin, He * We)
    pat = jnp.pad(pat, ((0, 0), (0, 0), (0, Np - He * We)))
    return pat.astype(jnp.bfloat16)


def att_double_conv2d(x_nchw, p, *, se):
    """x: (B, Cin, H, W) -> (B, Cout, H, W)  (NCHW in, NCHW out)."""
    B, Cin, H, W = x_nchw.shape
    Cout = p["dc1_w"].shape[0]
    He, We = H + 2, W + 2
    Np = pl.cdiv(He * We, 128) * 128        # lane-dense flat spatial extent

    pat = _im2col_patches(x_nchw, Np)

    # merged dc1 + att1 weights / epilogue affine (BN + conv bias folded)
    wA = jnp.concatenate([_w3x3_rows(p["dc1_w"]), _w3x3_rows(p["att1_w"])],
                         axis=0).astype(jnp.bfloat16)           # (2*Cout, 9*Cin)
    sA = jnp.concatenate([p["bn1_scale"],
                          jnp.ones((Cout,), jnp.float32)]).reshape(2 * Cout, 1)
    tA = jnp.concatenate([p["dc1_b"] * p["bn1_scale"] + p["bn1_shift"],
                          p["att1_b"]]).reshape(2 * Cout, 1)
    # dc2: one (Cout, Cout) slab per tap, rows ordered (kh, kw, cout)
    w2 = jnp.transpose(p["dc2_w"], (2, 3, 0, 1)).reshape(9 * Cout, Cout)
    w2 = w2.astype(jnp.bfloat16)
    s2 = p["bn2_scale"].reshape(Cout, 1)
    t2 = (p["dc2_b"] * p["bn2_scale"] + p["bn2_shift"]).reshape(Cout, 1)
    wa2 = p["att2_w"][:, :, 0, 0].astype(jnp.bfloat16)           # (Cout, Cout)
    ba2 = p["att2_b"].reshape(Cout, 1)

    # masks on the flat extended domain (host-built, lane-dense)
    rr = jnp.arange(He)[:, None]
    cc = jnp.arange(We)[None, :]
    md1 = ((rr >= 1) & (rr <= H) & (cc >= 1) & (cc <= W)).astype(jnp.float32)
    mout = ((rr < H) & (cc < W)).astype(jnp.float32)
    md1 = jnp.pad(md1.reshape(1, He * We), ((0, 0), (0, Np - He * We)))
    mout = jnp.pad(mout.reshape(1, He * We), ((0, 0), (0, Np - He * We)))

    inputs = [pat, wA, sA, tA, md1, mout, w2, s2, t2, wa2, ba2]
    in_specs = [
        pl.BlockSpec((1, 9 * Cin, Np), lambda i: (i, 0, 0)),
        pl.BlockSpec((2 * Cout, 9 * Cin), lambda i: (0, 0)),
        pl.BlockSpec((2 * Cout, 1), lambda i: (0, 0)),
        pl.BlockSpec((2 * Cout, 1), lambda i: (0, 0)),
        pl.BlockSpec((1, Np), lambda i: (0, 0)),
        pl.BlockSpec((1, Np), lambda i: (0, 0)),
        pl.BlockSpec((9 * Cout, Cout), lambda i: (0, 0)),
        pl.BlockSpec((Cout, 1), lambda i: (0, 0)),
        pl.BlockSpec((Cout, 1), lambda i: (0, 0)),
        pl.BlockSpec((Cout, Cout), lambda i: (0, 0)),
        pl.BlockSpec((Cout, 1), lambda i: (0, 0)),
    ]
    if se:
        Cr = p["se1_w"].shape[0]
        inputs += [p["se1_w"].astype(jnp.bfloat16), p["se1_b"].reshape(Cr, 1),
                   p["se2_w"].astype(jnp.bfloat16), p["se2_b"].reshape(Cout, 1)]
        in_specs += [
            pl.BlockSpec((Cr, Cout), lambda i: (0, 0)),
            pl.BlockSpec((Cr, 1), lambda i: (0, 0)),
            pl.BlockSpec((Cout, Cr), lambda i: (0, 0)),
            pl.BlockSpec((Cout, 1), lambda i: (0, 0)),
        ]

    kernel = functools.partial(_att_double_conv_kernel,
                               H=H, W=W, Cout=Cout, Np=Np, se=se)
    out = pl.pallas_call(
        kernel,
        out_shape=jax.ShapeDtypeStruct((B, Cout, Np), x_nchw.dtype),
        grid_spec=pltpu.PrefetchScalarGridSpec(
            num_scalar_prefetch=0,
            grid=(B,),
            in_specs=in_specs,
            # lane-dense (Np % 128 == 0) output slab -> unmasked full-lane
            # stores and a contiguous HBM writeback per grid step
            out_specs=pl.BlockSpec((1, Cout, Np), lambda i: (i, 0, 0)),
        ),
        compiler_params=pltpu.CompilerParams(
            dimension_semantics=("parallel",),      # batch elements across TCs
            vmem_limit_bytes=32 * 1024 * 1024),
    )(*inputs)
    # valid outputs sit at the top-left H x W of the flat extended grid; the
    # sliced result is already NCHW.
    return out[:, :, :He * We].reshape(B, Cout, He, We)[:, :, :H, :W]


@functools.partial(jax.jit, static_argnames=("se",))
def att_double_conv2d_forward(x_nchw, params, *, se=False):
    """PyTorch AttDoubleConv2d.forward: NCHW in, NCHW out."""
    return att_double_conv2d(x_nchw, params, se=se)


# ----------------------------------------------------------------------------
# Pure-JAX reference (for correctness check)
# ----------------------------------------------------------------------------

def _conv2d_ref(x, w, b):
    out = lax.conv_general_dilated(
        x, w, (1, 1), "SAME",
        dimension_numbers=("NCHW", "OIHW", "NCHW"),
        precision=lax.Precision.HIGHEST)
    return out + b[None, :, None, None]


def att_double_conv2d_ref(x, p, *, se):
    a1 = jax.nn.relu(_conv2d_ref(x, p["att1_w"], p["att1_b"]))
    a2 = jax.nn.sigmoid(_conv2d_ref(a1, p["att2_w"], p["att2_b"])) + 1.0
    s1 = p["bn1_scale"][None, :, None, None]
    h1 = p["bn1_shift"][None, :, None, None]
    s2 = p["bn2_scale"][None, :, None, None]
    h2 = p["bn2_shift"][None, :, None, None]
    d1 = jax.nn.relu(_conv2d_ref(x, p["dc1_w"], p["dc1_b"]) * s1 + h1)
    d2 = jax.nn.relu(_conv2d_ref(d1, p["dc2_w"], p["dc2_b"]) * s2 + h2)
    y = d2 * a2
    if se:
        m = jnp.mean(y, axis=(2, 3))
        h = jax.nn.relu(jnp.dot(m, p["se1_w"].T,
                                precision=lax.Precision.HIGHEST) + p["se1_b"])
        s = jax.nn.sigmoid(jnp.dot(h, p["se2_w"].T,
                                   precision=lax.Precision.HIGHEST) + p["se2_b"])
        y = y * s[:, :, None, None]
    return y


# ----------------------------------------------------------------------------
# Deterministic parameter init (PyTorch layouts, BN folded for inference)
# ----------------------------------------------------------------------------

def _bf16_round(v):
    # Conv/linear weights are made bf16-representable so the kernel's bf16
    # MXU-operand cast is lossless on weights; the kernel vs f32 reference
    # then differ only by bf16 rounding of intermediate activations.
    return v.astype(jnp.bfloat16).astype(jnp.float32)


def init_params(key, cin, cout, r=4):
    keys = iter(jax.random.split(key, 24))

    def nrm(shape, scale=0.1):
        return scale * jax.random.normal(next(keys), shape, jnp.float32)

    def bn_fold():
        gamma = 1.0 + 0.1 * jax.random.normal(next(keys), (cout,), jnp.float32)
        beta = nrm((cout,))
        rmean = nrm((cout,))
        rvar = 1.0 + 0.1 * jnp.abs(
            jax.random.normal(next(keys), (cout,), jnp.float32))
        scale = gamma / jnp.sqrt(rvar + 1e-5)
        shift = beta - rmean * scale
        return scale, shift

    cr = round(cout / r)
    p = {
        "dc1_w": _bf16_round(nrm((cout, cin, 3, 3))),
        "dc1_b": nrm((cout,)),
        "dc2_w": _bf16_round(nrm((cout, cout, 3, 3))),
        "dc2_b": nrm((cout,)),
        "att1_w": _bf16_round(nrm((cout, cin, 3, 3))),
        "att1_b": nrm((cout,)),
        "att2_w": _bf16_round(nrm((cout, cout, 1, 1))),
        "att2_b": nrm((cout,)),
        "se1_w": _bf16_round(nrm((cr, cout))),
        "se1_b": nrm((cr,)),
        "se2_w": _bf16_round(nrm((cout, cr))),
        "se2_b": nrm((cout,)),
    }
    p["bn1_scale"], p["bn1_shift"] = bn_fold()
    p["bn2_scale"], p["bn2_shift"] = bn_fold()
    return p


# ----------------------------------------------------------------------------
# Main
# ----------------------------------------------------------------------------

if __name__ == "__main__":
    key = jax.random.PRNGKey(0)
    kx, kp = jax.random.split(key)

    B, CIN, COUT, H, W = 2, 4, 16, 16, 16
    x = jax.random.normal(kx, (B, CIN, H, W), jnp.float32)
    # bf16-representable input -> the kernel's host-side bf16 patches cast is
    # lossless (see _bf16_round note above).
    x = x.astype(jnp.bfloat16).astype(jnp.float32)
    params = init_params(kp, CIN, COUT)

    for se in (False, True):
        out = att_double_conv2d_forward(x, params, se=se)
        jax.block_until_ready(out)
        assert out.shape == (B, COUT, H, W), out.shape
        assert bool(jnp.all(jnp.isfinite(out))), "non-finite output"
        ref = att_double_conv2d_ref(x, params, se=se)
        err = float(jnp.max(jnp.abs(out - ref)))
        assert err < 3e-2, f"mismatch vs reference (se={se}): max abs err {err}"

    print("KERNEL_OK")
</pallas_src>

<mosaic_0001>
module attributes {stable_mosaic.version = 11 : i64} {
  func.func @_att_double_conv_kernel(%arg0: i32, %arg1: memref<1x36x384xbf16, #tpu.memory_space<vmem>>, %arg2: memref<32x36xbf16, #tpu.memory_space<vmem>>, %arg3: memref<32x1xf32, #tpu.memory_space<vmem>>, %arg4: memref<32x1xf32, #tpu.memory_space<vmem>>, %arg5: memref<1x384xf32, #tpu.memory_space<vmem>>, %arg6: memref<1x384xf32, #tpu.memory_space<vmem>>, %arg7: memref<144x16xbf16, #tpu.memory_space<vmem>>, %arg8: memref<16x1xf32, #tpu.memory_space<vmem>>, %arg9: memref<16x1xf32, #tpu.memory_space<vmem>>, %arg10: memref<16x16xbf16, #tpu.memory_space<vmem>>, %arg11: memref<16x1xf32, #tpu.memory_space<vmem>>, %arg12: memref<1x16x384xf32, #tpu.memory_space<vmem>>) attributes {dimension_semantics = [#tpu.dimension_semantics<parallel>], iteration_bounds = array<i64: 2>, scalar_prefetch = 0 : i64, scratch_operands = 0 : i64, tpu.core_type = #tpu.core_type<tc>, window_params = [{transform_indices = @transform_0, window_bounds = array<i64: 1, 36, 384>}, {pipeline_mode = #tpu.pipeline_mode<synchronous>, transform_indices = @transform_1, window_bounds = array<i64: 32, 36>}, {pipeline_mode = #tpu.pipeline_mode<synchronous>, transform_indices = @transform_2, window_bounds = array<i64: 32, 1>}, {pipeline_mode = #tpu.pipeline_mode<synchronous>, transform_indices = @transform_3, window_bounds = array<i64: 32, 1>}, {pipeline_mode = #tpu.pipeline_mode<synchronous>, transform_indices = @transform_4, window_bounds = array<i64: 1, 384>}, {pipeline_mode = #tpu.pipeline_mode<synchronous>, transform_indices = @transform_5, window_bounds = array<i64: 1, 384>}, {pipeline_mode = #tpu.pipeline_mode<synchronous>, transform_indices = @transform_6, window_bounds = array<i64: 144, 16>}, {pipeline_mode = #tpu.pipeline_mode<synchronous>, transform_indices = @transform_7, window_bounds = array<i64: 16, 1>}, {pipeline_mode = #tpu.pipeline_mode<synchronous>, transform_indices = @transform_8, window_bounds = array<i64: 16, 1>}, {pipeline_mode = #tpu.pipeline_mode<synchronous>, transform_indices = @transform_9, window_bounds = array<i64: 16, 16>}, {pipeline_mode = #tpu.pipeline_mode<synchronous>, transform_indices = @transform_10, window_bounds = array<i64: 16, 1>}, {transform_indices = @transform_11, window_bounds = array<i64: 1, 16, 384>}]} {
    %c0 = arith.constant 0 : index
    %c0_0 = arith.constant 0 : index
    %0 = vector.load %arg2[%c0, %c0_0] : memref<32x36xbf16, #tpu.memory_space<vmem>>, vector<32x36xbf16>
    %c0_1 = arith.constant 0 : index
    %c0_2 = arith.constant 0 : index
    %c0_3 = arith.constant 0 : index
    %1 = vector.load %arg1[%c0_1, %c0_2, %c0_3] : memref<1x36x384xbf16, #tpu.memory_space<vmem>>, vector<1x36x384xbf16>
    %2 = vector.shape_cast %1 : vector<1x36x384xbf16> to vector<36x384xbf16>
    %cst = arith.constant dense<0.000000e+00> : vector<32x384xf32>
    %3 = tpu.matmul %0, %2, %cst {dimension_numbers = #tpu.dot_dimension_numbers<[1], [0], [0], [1], [0, 0, 1, 1], [], []>} : vector<32x36xbf16>, vector<36x384xbf16>, vector<32x384xf32> -> vector<32x384xf32>
    %c0_4 = arith.constant 0 : index
    %c0_5 = arith.constant 0 : index
    %4 = vector.load %arg3[%c0_4, %c0_5] : memref<32x1xf32, #tpu.memory_space<vmem>>, vector<32x1xf32>
    %5 = vector.broadcast %4 : vector<32x1xf32> to vector<32x384xf32>
    %6 = arith.mulf %3, %5 : vector<32x384xf32>
    %c0_6 = arith.constant 0 : index
    %c0_7 = arith.constant 0 : index
    %7 = vector.load %arg4[%c0_6, %c0_7] : memref<32x1xf32, #tpu.memory_space<vmem>>, vector<32x1xf32>
    %8 = vector.broadcast %7 : vector<32x1xf32> to vector<32x384xf32>
    %9 = arith.addf %6, %8 : vector<32x384xf32>
    %cst_8 = arith.constant 0.000000e+00 : f32
    %10 = vector.broadcast %cst_8 : f32 to vector<32x384xf32>
    %11 = arith.maximumf %9, %10 : vector<32x384xf32>
    %12 = vector.extract_strided_slice %11 {offsets = [0, 0], sizes = [16, 384], strides = [1, 1]} : vector<32x384xf32> to vector<16x384xf32>
    %c0_9 = arith.constant 0 : index
    %c0_10 = arith.constant 0 : index
    %13 = vector.load %arg5[%c0_9, %c0_10] : memref<1x384xf32, #tpu.memory_space<vmem>>, vector<1x384xf32>
    %14 = vector.broadcast %13 : vector<1x384xf32> to vector<16x384xf32>
    %15 = arith.mulf %12, %14 : vector<16x384xf32>
    %16 = vector.extract_strided_slice %11 {offsets = [16, 0], sizes = [16, 384], strides = [1, 1]} : vector<32x384xf32> to vector<16x384xf32>
    %c365_i32 = arith.constant 365 : i32
    %17 = tpu.dynamic_rotate %16 by %c365_i32 dim 1 : vector<16x384xf32>, i32 -> vector<16x384xf32>
    %c0_11 = arith.constant 0 : index
    %c0_12 = arith.constant 0 : index
    %18 = vector.load %arg10[%c0_11, %c0_12] : memref<16x16xbf16, #tpu.memory_space<vmem>>, vector<16x16xbf16>
    %19 = arith.truncf %17 : vector<16x384xf32> to vector<16x384xbf16>
    %cst_13 = arith.constant dense<0.000000e+00> : vector<16x384xf32>
    %20 = tpu.matmul %18, %19, %cst_13 {dimension_numbers = #tpu.dot_dimension_numbers<[1], [0], [0], [1], [0, 0, 1, 1], [], []>} : vector<16x16xbf16>, vector<16x384xbf16>, vector<16x384xf32> -> vector<16x384xf32>
    %c0_14 = arith.constant 0 : index
    %c0_15 = arith.constant 0 : index
    %21 = vector.load %arg11[%c0_14, %c0_15] : memref<16x1xf32, #tpu.memory_space<vmem>>, vector<16x1xf32>
    %22 = vector.broadcast %21 : vector<16x1xf32> to vector<16x384xf32>
    %23 = arith.addf %20, %22 : vector<16x384xf32>
    %24 = arith.negf %23 : vector<16x384xf32>
    %25 = math.exp %24 : vector<16x384xf32>
    %cst_16 = arith.constant 1.000000e+00 : f32
    %26 = vector.broadcast %cst_16 : f32 to vector<16x384xf32>
    %27 = arith.addf %26, %25 : vector<16x384xf32>
    %28 = arith.divf %26, %27 : vector<16x384xf32>
    %cst_17 = arith.constant 1.000000e+00 : f32
    %29 = vector.broadcast %cst_17 : f32 to vector<16x384xf32>
    %30 = arith.addf %28, %29 : vector<16x384xf32>
    %cst_18 = arith.constant 0.000000e+00 : f32
    %31 = vector.broadcast %cst_18 : f32 to vector<16x384xf32>
    %c0_19 = arith.constant 0 : index
    %c0_20 = arith.constant 0 : index
    %32 = vector.load %arg7[%c0_19, %c0_20] : memref<144x16xbf16, #tpu.memory_space<vmem>>, vector<16x16xbf16>
    %33 = arith.truncf %15 : vector<16x384xf32> to vector<16x384xbf16>
    %cst_21 = arith.constant dense<0.000000e+00> : vector<16x384xf32>
    %34 = tpu.matmul %32, %33, %cst_21 {dimension_numbers = #tpu.dot_dimension_numbers<[1], [0], [0], [1], [0, 0, 1, 1], [], []>} : vector<16x16xbf16>, vector<16x384xbf16>, vector<16x384xf32> -> vector<16x384xf32>
    %35 = arith.addf %31, %34 : vector<16x384xf32>
    %c383_i32 = arith.constant 383 : i32
    %36 = tpu.dynamic_rotate %15 by %c383_i32 dim 1 : vector<16x384xf32>, i32 -> vector<16x384xf32>
    %c16 = arith.constant 16 : index
    %c0_22 = arith.constant 0 : index
    %37 = vector.load %arg7[%c16, %c0_22] : memref<144x16xbf16, #tpu.memory_space<vmem>>, vector<16x16xbf16>
    %38 = arith.truncf %36 : vector<16x384xf32> to vector<16x384xbf16>
    %cst_23 = arith.constant dense<0.000000e+00> : vector<16x384xf32>
    %39 = tpu.matmul %37, %38, %cst_23 {dimension_numbers = #tpu.dot_dimension_numbers<[1], [0], [0], [1], [0, 0, 1, 1], [], []>} : vector<16x16xbf16>, vector<16x384xbf16>, vector<16x384xf32> -> vector<16x384xf32>
    %40 = arith.addf %35, %39 : vector<16x384xf32>
    %c382_i32 = arith.constant 382 : i32
    %41 = tpu.dynamic_rotate %15 by %c382_i32 dim 1 : vector<16x384xf32>, i32 -> vector<16x384xf32>
    %c32 = arith.constant 32 : index
    %c0_24 = arith.constant 0 : index
    %42 = vector.load %arg7[%c32, %c0_24] : memref<144x16xbf16, #tpu.memory_space<vmem>>, vector<16x16xbf16>
    %43 = arith.truncf %41 : vector<16x384xf32> to vector<16x384xbf16>
    %cst_25 = arith.constant dense<0.000000e+00> : vector<16x384xf32>
    %44 = tpu.matmul %42, %43, %cst_25 {dimension_numbers = #tpu.dot_dimension_numbers<[1], [0], [0], [1], [0, 0, 1, 1], [], []>} : vector<16x16xbf16>, vector<16x384xbf16>, vector<16x384xf32> -> vector<16x384xf32>
    %45 = arith.addf %40, %44 : vector<16x384xf32>
    %c366_i32 = arith.constant 366 : i32
    %46 = tpu.dynamic_rotate %15 by %c366_i32 dim 1 : vector<16x384xf32>, i32 -> vector<16x384xf32>
    %c48 = arith.constant 48 : index
    %c0_26 = arith.constant 0 : index
    %47 = vector.load %arg7[%c48, %c0_26] : memref<144x16xbf16, #tpu.memory_space<vmem>>, vector<16x16xbf16>
    %48 = arith.truncf %46 : vector<16x384xf32> to vector<16x384xbf16>
    %cst_27 = arith.constant dense<0.000000e+00> : vector<16x384xf32>
    %49 = tpu.matmul %47, %48, %cst_27 {dimension_numbers = #tpu.dot_dimension_numbers<[1], [0], [0], [1], [0, 0, 1, 1], [], []>} : vector<16x16xbf16>, vector<16x384xbf16>, vector<16x384xf32> -> vector<16x384xf32>
    %50 = arith.addf %45, %49 : vector<16x384xf32>
    %c365_i32_28 = arith.constant 365 : i32
    %51 = tpu.dynamic_rotate %15 by %c365_i32_28 dim 1 : vector<16x384xf32>, i32 -> vector<16x384xf32>
    %c64 = arith.constant 64 : index
    %c0_29 = arith.constant 0 : index
    %52 = vector.load %arg7[%c64, %c0_29] : memref<144x16xbf16, #tpu.memory_space<vmem>>, vector<16x16xbf16>
    %53 = arith.truncf %51 : vector<16x384xf32> to vector<16x384xbf16>
    %cst_30 = arith.constant dense<0.000000e+00> : vector<16x384xf32>
    %54 = tpu.matmul %52, %53, %cst_30 {dimension_numbers = #tpu.dot_dimension_numbers<[1], [0], [0], [1], [0, 0, 1, 1], [], []>} : vector<16x16xbf16>, vector<16x384xbf16>, vector<16x384xf32> -> vector<16x384xf32>
    %55 = arith.addf %50, %54 : vector<16x384xf32>
    %c364_i32 = arith.constant 364 : i32
    %56 = tpu.dynamic_rotate %15 by %c364_i32 dim 1 : vector<16x384xf32>, i32 -> vector<16x384xf32>
    %c80 = arith.constant 80 : index
    %c0_31 = arith.constant 0 : index
    %57 = vector.load %arg7[%c80, %c0_31] : memref<144x16xbf16, #tpu.memory_space<vmem>>, vector<16x16xbf16>
    %58 = arith.truncf %56 : vector<16x384xf32> to vector<16x384xbf16>
    %cst_32 = arith.constant dense<0.000000e+00> : vector<16x384xf32>
    %59 = tpu.matmul %57, %58, %cst_32 {dimension_numbers = #tpu.dot_dimension_numbers<[1], [0], [0], [1], [0, 0, 1, 1], [], []>} : vector<16x16xbf16>, vector<16x384xbf16>, vector<16x384xf32> -> vector<16x384xf32>
    %60 = arith.addf %55, %59 : vector<16x384xf32>
    %c348_i32 = arith.constant 348 : i32
    %61 = tpu.dynamic_rotate %15 by %c348_i32 dim 1 : vector<16x384xf32>, i32 -> vector<16x384xf32>
    %c96 = arith.constant 96 : index
    %c0_33 = arith.constant 0 : index
    %62 = vector.load %arg7[%c96, %c0_33] : memref<144x16xbf16, #tpu.memory_space<vmem>>, vector<16x16xbf16>
    %63 = arith.truncf %61 : vector<16x384xf32> to vector<16x384xbf16>
    %cst_34 = arith.constant dense<0.000000e+00> : vector<16x384xf32>
    %64 = tpu.matmul %62, %63, %cst_34 {dimension_numbers = #tpu.dot_dimension_numbers<[1], [0], [0], [1], [0, 0, 1, 1], [], []>} : vector<16x16xbf16>, vector<16x384xbf16>, vector<16x384xf32> -> vector<16x384xf32>
    %65 = arith.addf %60, %64 : vector<16x384xf32>
    %c347_i32 = arith.constant 347 : i32
    %66 = tpu.dynamic_rotate %15 by %c347_i32 dim 1 : vector<16x384xf32>, i32 -> vector<16x384xf32>
    %c112 = arith.constant 112 : index
    %c0_35 = arith.constant 0 : index
    %67 = vector.load %arg7[%c112, %c0_35] : memref<144x16xbf16, #tpu.memory_space<vmem>>, vector<16x16xbf16>
    %68 = arith.truncf %66 : vector<16x384xf32> to vector<16x384xbf16>
    %cst_36 = arith.constant dense<0.000000e+00> : vector<16x384xf32>
    %69 = tpu.matmul %67, %68, %cst_36 {dimension_numbers = #tpu.dot_dimension_numbers<[1], [0], [0], [1], [0, 0, 1, 1], [], []>} : vector<16x16xbf16>, vector<16x384xbf16>, vector<16x384xf32> -> vector<16x384xf32>
    %70 = arith.addf %65, %69 : vector<16x384xf32>
    %c346_i32 = arith.constant 346 : i32
    %71 = tpu.dynamic_rotate %15 by %c346_i32 dim 1 : vector<16x384xf32>, i32 -> vector<16x384xf32>
    %c128 = arith.constant 128 : index
    %c0_37 = arith.constant 0 : index
    %72 = vector.load %arg7[%c128, %c0_37] : memref<144x16xbf16, #tpu.memory_space<vmem>>, vector<16x16xbf16>
    %73 = arith.truncf %71 : vector<16x384xf32> to vector<16x384xbf16>
    %cst_38 = arith.constant dense<0.000000e+00> : vector<16x384xf32>
    %74 = tpu.matmul %72, %73, %cst_38 {dimension_numbers = #tpu.dot_dimension_numbers<[1], [0], [0], [1], [0, 0, 1, 1], [], []>} : vector<16x16xbf16>, vector<16x384xbf16>, vector<16x384xf32> -> vector<16x384xf32>
    %75 = arith.addf %70, %74 : vector<16x384xf32>
    %c0_39 = arith.constant 0 : index
    %c0_40 = arith.constant 0 : index
    %76 = vector.load %arg8[%c0_39, %c0_40] : memref<16x1xf32, #tpu.memory_space<vmem>>, vector<16x1xf32>
    %77 = vector.broadcast %76 : vector<16x1xf32> to vector<16x384xf32>
    %78 = arith.mulf %75, %77 : vector<16x384xf32>
    %c0_41 = arith.constant 0 : index
    %c0_42 = arith.constant 0 : index
    %79 = vector.load %arg9[%c0_41, %c0_42] : memref<16x1xf32, #tpu.memory_space<vmem>>, vector<16x1xf32>
    %80 = vector.broadcast %79 : vector<16x1xf32> to vector<16x384xf32>
    %81 = arith.addf %78, %80 : vector<16x384xf32>
    %cst_43 = arith.constant 0.000000e+00 : f32
    %82 = vector.broadcast %cst_43 : f32 to vector<16x384xf32>
    %83 = arith.maximumf %81, %82 : vector<16x384xf32>
    %84 = arith.mulf %83, %30 : vector<16x384xf32>
    %85 = vector.shape_cast %84 : vector<16x384xf32> to vector<1x16x384xf32>
    %c0_44 = arith.constant 0 : index
    %c0_45 = arith.constant 0 : index
    %c0_46 = arith.constant 0 : index
    %86 = vector.load %arg12[%c0_44, %c0_45, %c0_46] : memref<1x16x384xf32, #tpu.memory_space<vmem>>, vector<1x16x384xf32>
    tpu.vector_store %arg12[%c0_44, %c0_45, %c0_46], %85 {strides = array<i32>} : memref<1x16x384xf32, #tpu.memory_space<vmem>>, vector<1x16x384xf32>,
    return
  }
  func.func @transform_0(%arg0: i32) -> (i32, i32, i32) {
    %c0_i32 = arith.constant 0 : i32
    %c0_i32_0 = arith.constant 0 : i32
    %c0_i32_1 = arith.constant 0 : i32
    return %arg0, %c0_i32, %c0_i32_0 : i32, i32, i32
  }
  func.func @transform_1(%arg0: i32) -> (i32, i32) {
    %c0_i32 = arith.constant 0 : i32
    %c0_i32_0 = arith.constant 0 : i32
    %c0_i32_1 = arith.constant 0 : i32
    return %c0_i32, %c0_i32_0 : i32, i32
  }
  func.func @transform_2(%arg0: i32) -> (i32, i32) {
    %c0_i32 = arith.constant 0 : i32
    %c0_i32_0 = arith.constant 0 : i32
    %c0_i32_1 = arith.constant 0 : i32
    return %c0_i32, %c0_i32_0 : i32, i32
  }
  func.func @transform_3(%arg0: i32) -> (i32, i32) {
    %c0_i32 = arith.constant 0 : i32
    %c0_i32_0 = arith.constant 0 : i32
    %c0_i32_1 = arith.constant 0 : i32
    return %c0_i32, %c0_i32_0 : i32, i32
  }
  func.func @transform_4(%arg0: i32) -> (i32, i32) {
    %c0_i32 = arith.constant 0 : i32
    %c0_i32_0 = arith.constant 0 : i32
    %c0_i32_1 = arith.constant 0 : i32
    return %c0_i32, %c0_i32_0 : i32, i32
  }
  func.func @transform_5(%arg0: i32) -> (i32, i32) {
    %c0_i32 = arith.constant 0 : i32
    %c0_i32_0 = arith.constant 0 : i32
    %c0_i32_1 = arith.constant 0 : i32
    return %c0_i32, %c0_i32_0 : i32, i32
  }
  func.func @transform_6(%arg0: i32) -> (i32, i32) {
    %c0_i32 = arith.constant 0 : i32
    %c0_i32_0 = arith.constant 0 : i32
    %c0_i32_1 = arith.constant 0 : i32
    return %c0_i32, %c0_i32_0 : i32, i32
  }
  func.func @transform_7(%arg0: i32) -> (i32, i32) {
    %c0_i32 = arith.constant 0 : i32
    %c0_i32_0 = arith.constant 0 : i32
    %c0_i32_1 = arith.constant 0 : i32
    return %c0_i32, %c0_i32_0 : i32, i32
  }
  func.func @transform_8(%arg0: i32) -> (i32, i32) {
    %c0_i32 = arith.constant 0 : i32
    %c0_i32_0 = arith.constant 0 : i32
    %c0_i32_1 = arith.constant 0 : i32
    return %c0_i32, %c0_i32_0 : i32, i32
  }
  func.func @transform_9(%arg0: i32) -> (i32, i32) {
    %c0_i32 = arith.constant 0 : i32
    %c0_i32_0 = arith.constant 0 : i32
    %c0_i32_1 = arith.constant 0 : i32
    return %c0_i32, %c0_i32_0 : i32, i32
  }
  func.func @transform_10(%arg0: i32) -> (i32, i32) {
    %c0_i32 = arith.constant 0 : i32
    %c0_i32_0 = arith.constant 0 : i32
    %c0_i32_1 = arith.constant 0 : i32
    return %c0_i32, %c0_i32_0 : i32, i32
  }
  func.func @transform_11(%arg0: i32) -> (i32, i32, i32) {
    %c0_i32 = arith.constant 0 : i32
    %c0_i32_0 = arith.constant 0 : i32
    %c0_i32_1 = arith.constant 0 : i32
    return %arg0, %c0_i32, %c0_i32_0 : i32, i32, i32
  }
}

</mosaic_0001>

<bundles_post_ra>
// kernel: att_double_conv2d_forward.1
= control target key start
LH: loop header
LB: loop body
LE: loop exit
PB: predicated region body
PF: predicated region fallthrough
CT: control target
= control target key end

     0   :  { %s2531_s17 = smov 0   ;;  %s2879_s0 = inlined_call_operand.vmem [shape: bf16[2,36,384], index: 0, kind: input, shape index: {}]   ;;  %s2880_s1 = inlined_call_operand.vmem [shape: bf16[32,36], index: 1, kind: input, shape index: {}]   ;;  %s2881_s2 = inlined_call_operand.vmem [shape: f32[32,1], index: 2, kind: input, shape index: {}]   ;;  %s2882_s3 = inlined_call_operand.vmem [shape: f32[32,1], index: 3, kind: input, shape index: {}]   ;;  %s2883_s4 = inlined_call_operand.vmem [shape: f32[1,384], index: 4, kind: input, shape index: {}]   ;;  %s2884_s5 = inlined_call_operand.vmem [shape: f32[1,384], index: 5, kind: input, shape index: {}]   ;;  %s2885_s6 = inlined_call_operand.vmem [shape: bf16[144,16], index: 6, kind: input, shape index: {}]   ;;  %s2886_s7 = inlined_call_operand.vmem [shape: f32[16,1], index: 7, kind: input, shape index: {}]   ;;  %s2887_s8 = inlined_call_operand.vmem [shape: f32[16,1], index: 8, kind: input, shape index: {}]   ;;  %s2888_s9 = inlined_call_operand.vmem [shape: bf16[16,16], index: 9, kind: input, shape index: {}]   ;;  %s2889_s10 = inlined_call_operand.vmem [shape: f32[16,1], index: 10, kind: input, shape index: {}]   ;;  %s2890_s11 = inlined_call_operand.vmem [shape: f32[2,16,384], index: 11, kind: output, shape index: {}]  }
   0x1 LB: > { %s2026_s5 = sadd.s32 4294967295, %s2458_s17   ;;  %p2030_p0 = scmp.ge.s32.totalorder %s2458_s17, 1  ;;  %s2458_s17 = sphi %s2531_s17, %s21_s17  }
   0x2   : > { %p337_p1 = scmp.lt.s32.totalorder %s2458_s17, 3 }
   0x4   : > { %p338_p2 = pnand %p2030_p0, %p337_p1 }
   0x5   : > { %p377_p3 = scmp.lt.s32.totalorder (!%p338_p2), %s2026_s5, 1  ;;  %v2416_v0 = vld [vmem:[%s2880_s1] sm:$0xff] (!%p338_p2)   ;;  %v2460_v1 = vmov (!%p338_p2), 0   ;;  %vm452_vm0 = vcmask (!%p338_p2), 293888   ;;  %v573_v2 = vld [vmem:[%s2881_s2 + $0x10] sm:$0xff] (!%p338_p2)  ;;  %v574_v4 = vld [vmem:[%s2881_s2 + $0x18] sm:$0xff] (!%p338_p2)  ;;  %v657_v27 = vlaneseq (!%p338_p2) }
   0x6   : > { %341 = sbr.rel (%p338_p2) target bundleno = 716 (0x2cc), region = 64  ;;  %501 = vmatprep.mubr.bf16.mxu0 (!%p338_p2), %v2460_v1  ;;  %2268 = vset.pattern.permute.xlu0 (!%p338_p2), %v2460_v1  ;;  %v609_v3 = vld [vmem:[%s2882_s3 + $0x10] sm:$0xff] (!%p338_p2)  ;;  %v610_v5 = vld [vmem:[%s2882_s3 + $0x18] sm:$0xff] (!%p338_p2)  ;;  %v571_v7 = vld [vmem:[%s2881_s2] sm:$0xff] (!%p338_p2)  ;;  %vm459_vm1 = vcmask (!%p338_p2), 1041408   ;;  %s2461_s26 = smov (!%p338_p2), 109  }
   0x7   : > { %2118 = vmatprep.mubr.msk.bf16.mxu1 (!%p338_p2), %vm452_vm0, %v2416_v0  ;;  %2269 = vset.pattern.permute.xlu1 (!%p338_p2), %v2460_v1  ;;  %v572_v9 = vld [vmem:[%s2881_s2 + $0x8] sm:$0xff] (!%p338_p2)  ;;  %v607_v18 = vld [vmem:[%s2882_s3] sm:$0xff] (!%p338_p2)  ;;  %v658_v30 = vshrl.u32 (!%p338_p2), %v657_v27, 7  ;;  %s2462_s27 = smov (!%p338_p2), 127   ;;  %vm2464_vm2 = vmmov (!%p338_p2), 0   ;;  %s2465_s28 = smov (!%p338_p2), 126  }
   0x8   : > { %587 = vperm.xlu0 (!%p338_p2), %2268, %v573_v2   ;;  %623 = vperm.xlu1 (!%p338_p2), %2269, %v609_v3   ;;  %v608_v19 = vld [vmem:[%s2882_s3 + $0x8] sm:$0xff] (!%p338_p2)  ;;  %v655_v32 = vld [vmem:[%s2883_s4] sm:$0x7] (!%p338_p2)  ;;  %s2466_s29 = smov (!%p338_p2), 110   ;;  %s2467_s30 = smov (!%p338_p2), 108   ;;  %vm721_vm5 = vcmask (!%p338_p2), 130048  }
   0x9   : > { %v2417_v22 = vld [vmem:[%s2880_s1 + $0x8] sm:$0xff] (!%p338_p2)   ;;  %v659_v31 = vsub.s32 (!%p338_p2), 0, %v658_v30  ;;  %v663_v33 = vsub.s32 (!%p338_p2), 1, %v658_v30  ;;  %v667_v34 = vsub.s32 (!%p338_p2), 2, %v658_v30  ;;  %s2469_s13 = smov (!%p338_p2), 91   ;;  %s2470_s14 = smov (!%p338_p2), 90  }
   0xb   : > { %v660_v43 = vrot.slane (!%p338_p2), %v655_v32, %v659_v31  ;;  %v664_v46 = vrot.slane (!%p338_p2), %v655_v32, %v663_v33  ;;  %v668_v47 = vrot.slane (!%p338_p2), %v655_v32, %v667_v34 }
   0xc   : > { %592 = vperm.xlu0 (!%p338_p2), %2268, %v574_v4   ;;  %628 = vperm.xlu1 (!%p338_p2), %2269, %v610_v5  }
   0xd   : > { %s2892_s5 = smov (!%p377_p3, %s2026_s5), 1 }
   0xe   : > { %s2247_s24 = smul.u32 60, %s2892_s5 }
  0x10   : > { %s381_s12 = scalar_lea.vmem %s2879_s0, %s2247_s24  ;;  %577 = vperm.xlu0 %2268, %v571_v7   ;;  %582 = vperm.xlu1 %2269, %v572_v9  }
  0x11   : > { %v2405_v6 = vld [vmem:[%s381_s12 + $0x4] ss:$12 sps:$4 sm:$0xff]   ;;  %v2407_v8 = vld [vmem:[%s381_s12 + $0x8] ss:$12 sps:$4 sm:$0xff]   ;;  %v2408_v10 = vld [vmem:[%s381_s12] ss:$12 sps:$4 sm:$0xff]  }
  0x12   : > { %469 = vmatprep.subr.bf16.mxu0 %v2405_v6  ;;  %2112 = vmatprep.subr.bf16.mxu1 %v2407_v8  ;;  %v2409_v11 = vld [vmem:[%s381_s12 + $0x1c] ss:$12 sps:$4 sm:$0xff]   ;;  %v2411_v12 = vld [vmem:[%s381_s12 + $0x20] ss:$12 sps:$4 sm:$0xff]   ;;  %v2412_v13 = vld [vmem:[%s381_s12 + $0x18] ss:$12 sps:$4 sm:$0xff]  }
  0x13   : > { %470 = vmatpush1.bf16.msra.mxu0 %v2408_v10  ;;  %2113 = vmatpush3.bf16.msra.mxu1 %v2407_v8  ;;  %v400_v14 = vld [vmem:[%s381_s12 + $0x30] sm:$0x33]  ;;  %v2414_v16 = vld [vmem:[%s381_s12 + $0x38] ss:$0 sps:$4 sm:$0x33]   ;;  %s2468_s12 = smov 92  }
  0x14   : > { %471 = vmatprep.subr.bf16.mxu0 %v2409_v11  ;;  %v2042_v15 = vcombine.high %v400_v14, %v400_v14  ;;  %v2041_v17 = vcombine.low %v400_v14, %v400_v14  ;;  %2114 = vmatprep.subr.bf16.mxu1 %v2411_v12  ;;  %v467_v21 = vsel %vm459_vm1, %v2414_v16, 0 }
  0x15   : > { %613 = vperm.xlu0 %2268, %v607_v18   ;;  %618 = vperm.xlu1 %2269, %v608_v19  }
  0x16   : > { %v461_v20 = vsel %vm459_vm1, %v2041_v17, 0 }
  0x17   : > { %472 = vmatpush1.bf16.msra.mxu0 %v2412_v13  ;;  %2115 = vmatpush3.bf16.msra.mxu1 %v2411_v12 }
  0x18   : > { %2044 = vmatprep.subr.msk.bf16.mxu0 %vm459_vm1, %v2042_v15  ;;  %2246 = vmatprep.subr.msk.bf16.mxu1 %vm459_vm1, %v2414_v16 }
  0x1b   : > { %474 = vmatpush1.bf16.msra.mxu0 %v461_v20  ;;  %2117 = vmatpush3.bf16.msra.mxu1 %v467_v21 }
  0x1e   : > { %2045 = vmatmul.mubr.msk.bf16.vlgmr.msra.gmra.mrb[0].mxu0 %vm452_vm0, %v2416_v0  ;;  %2119 = vmatmul.mubr.msk.bf16.vlgmr.msra.gmra.mrb[0].mxu1 %vm452_vm0, %v2417_v22 }
  0x1f   : > { %511 = vmatprep.mubr.bf16.mxu0 %v2460_v1  ;;  %757 = vmatprep.mubr.bf16.mxu1 %v2460_v1 }
  0x26   : > { %2046 = vmatmul.mubr.msk.bf16.gmra.mrb[4].mxu0 %vm452_vm0, %v2417_v22 }
  0x87   : > { %v588_v23 = vpop.permute.xlu0 %587  ;;  %v2588_v24 = vpop.permute.xlu1 %623 }
  0x8b   : > { %v2590_v25 = vpop.permute.xlu0 %592  ;;  %v2592_v26 = vpop.permute.xlu1 %628 }
  0x8f   : > { %v578_v28 = vpop.permute.xlu0 %577  ;;  %v583_v29 = vpop.permute.xlu1 %582 }
  0x94   : > { %v614_v35 = vpop.permute.xlu0 %613  ;;  %v619_v36 = vpop.permute.xlu1 %618 }
  0xf1   : > { %v503_v37 = vpop.f32.mrb[0].mxu0  ;;  %v2120_v38 = vpop.f32.mrb[0].mxu1 }
  0xf2   : > { %v595_v39 = vmul.f32 %v578_v28, %v503_v37  ;;  %v603_v40 = vmul.f32 %v2120_v38, %v588_v23  ;;  %v505_v41 = vpop.f32.mrb[1].mxu0  ;;  %v556_v42 = vpop.f32.mrb[1].mxu1 }
  0xf3   : > { %v596_v44 = vmul.f32 %v578_v28, %v505_v41  ;;  %v597_v45 = vmul.f32 %v578_v28, %v556_v42  ;;  %v507_v48 = vpop.f32.mrb[2].mxu0  ;;  %v2121_v49 = vpop.f32.mrb[2].mxu1  ;;  %v2463_v41 = vmov 0.0   ;;  %v704_v42 = vld [vmem:[%s2889_s10] sm:$0xff] }
  0xf4   : > { %v639_v50 = vadd.f32 %v2588_v24, %v603_v40  ;;  %v631_v51 = vadd.f32 %v614_v35, %v595_v39  ;;  %v598_v52 = vmul.f32 %v583_v29, %v507_v48  ;;  %v606_v53 = vmul.f32 %v2121_v49, %v2590_v25  ;;  %v509_v54 = vpop.f32.mrb[3].mxu0  ;;  %v559_v55 = vpop.f32.mrb[3].mxu1  ;;  %2122 = vmatprep.subr.bf16.mxu0 %v2463_v41 }
  0xf5   : > { %v632_v56 = vadd.f32 %v614_v35, %v596_v44  ;;  %v633_v57 = vadd.f32 %v614_v35, %v597_v45  ;;  %v599_v58 = vmul.f32 %v583_v29, %v509_v54  ;;  %v600_v59 = vmul.f32 %v583_v29, %v559_v55  ;;  %2124 = vmatprep.mubr.msk.bf16.mxu0 %vm2464_vm2, %v2463_v41  ;;  %v1935_v44 = vld [vmem:[%s2887_s8] sm:$0xff]  ;;  %v705_v45 = vld [vmem:[%s2889_s10 + $0x8] sm:$0xff] }
  0xf6   : > { %v651_v60 = vmax.f32 %v639_v50, 0.0  ;;  %v643_v61 = vmax.f32 %v631_v51, 0.0  ;;  %v642_v62 = vadd.f32 %v2592_v26, %v606_v53  ;;  %v634_v63 = vadd.f32 %v619_v36, %v598_v52 }
  0xf7   : > { %v644_v0 = vmax.f32 %v632_v56, 0.0  ;;  %v645_v2 = vmax.f32 %v633_v57, 0.0  ;;  %v635_v3 = vadd.f32 %v619_v36, %v599_v58  ;;  %v636_v4 = vadd.f32 %v619_v36, %v600_v59 }
  0xf8   : > { %v654_v5 = vmax.f32 %v642_v62, 0.0  ;;  %v646_v6 = vmax.f32 %v634_v63, 0.0  ;;  %v2603_v11 = vmul.f32 %v660_v43, %v643_v61  ;;  %v2659_v49 = vand.u32 127, %v657_v27 }
  0xf9   : > { %v2601_v7 = vmul.f32 %v668_v47, %v645_v2  ;;  %v647_v8 = vmax.f32 %v635_v3, 0.0  ;;  %v648_v9 = vmax.f32 %v636_v4, 0.0  ;;  %v513_v10 = vpop.f32.mrb[4].mxu0  ;;  %v2607_v16 = vmul.f32 %v664_v46, %v644_v0 }
  0xfa   : > { %v2605_v12 = vmul.f32 %v660_v43, %v646_v6  ;;  %v601_v13 = vmul.f32 %v588_v23, %v513_v10  ;;  %v515_v14 = vpop.f32.mrb[5].mxu0  ;;  %v2270_v15 = vpack.i.bf16 %v654_v5, %v651_v60  ;;  %v1917_v43 = vld [vmem:[%s2886_s7] sm:$0xff]  ;;  %vm692_vm3 = vcmp.lt.s32.totalorder %v2659_v49, 109 }
  0xfb   : > { %v2609_v17 = vmul.f32 %v664_v46, %v647_v8  ;;  %v2611_v18 = vmul.f32 %v668_v47, %v648_v9  ;;  %v602_v19 = vmul.f32 %v588_v23, %v515_v14  ;;  %v517_v20 = vpop.f32.mrb[6].mxu0  ;;  %v1918_v46 = vld [vmem:[%s2886_s7 + $0x8] sm:$0xff]  ;;  %vm868_vm4 = vcmp.lt.s32.totalorder %v2659_v49, 127 }
  0xfc   : > { %v637_v21 = vadd.f32 %v2588_v24, %v601_v13  ;;  %v604_v22 = vmul.f32 %v2590_v25, %v517_v20  ;;  %2271 = vrot.lane.b32.xlu1 %v2270_v15, %s2461_s26  ;;  %v519_v28 = vpop.f32.mrb[7].mxu0  ;;  %v2295_v29 = vpack.i.bf16 %v2605_v12, %v2603_v11  ;;  %v853_v40 = vpack.c.bf16 %v2605_v12, %v2603_v11  ;;  %v1936_v47 = vld [vmem:[%s2887_s8 + $0x8] sm:$0xff]  ;;  %v2418_v15 = vld [vmem:[%s2888_s9] sm:$0xff]  }
  0xfd   : > { %v638_v30 = vadd.f32 %v2588_v24, %v602_v19  ;;  %v605_v31 = vmul.f32 %v2590_v25, %v519_v28  ;;  %v2285_v32 = vpack.i.bf16 %v2609_v17, %v2607_v16  ;;  %v2305_v23 = vpack.i.bf16 %v2611_v18, %v2601_v7 }
  0xfe   : > { %v649_v33 = vmax.f32 %v637_v21, 0.0  ;;  %v640_v34 = vadd.f32 %v2592_v26, %v604_v22  ;;  %v854_v25 = vpack.c.bf16 %v2609_v17, %v2607_v16  ;;  %vm1076_vm6 = vcmp.lt.s32.totalorder %v2659_v49, 126 }
  0xff   : > { %v650_v35 = vmax.f32 %v638_v30, 0.0  ;;  %v641_v36 = vadd.f32 %v2592_v26, %v605_v31  ;;  %v855_v26 = vpack.c.bf16 %v2611_v18, %v2601_v7  ;;  %vm1198_vm7 = vcmp.lt.s32.totalorder %v2659_v49, 110 }
 0x100   : > { %v652_v37 = vmax.f32 %v640_v34, 0.0  ;;  %2286 = vrot.lane.b32.xlu1 %v2285_v32, %s2462_s27  ;;  %vm1441_vm8 = vcmp.lt.s32.totalorder %v2659_v49, 108  ;;  %vm1563_vm9 = vcmp.lt.s32.totalorder %v2659_v49, 92  ;;  %vm1685_vm10 = vcmp.lt.s32.totalorder %v2659_v49, 91 }
 0x101   : > { %v653_v38 = vmax.f32 %v641_v36, 0.0  ;;  %vm1807_vm11 = vcmp.lt.s32.totalorder %v2659_v49, 90  ;;  %v2427_v49 = vld [vmem:[%s2885_s6 + $0x40] sm:$0xff]  }
 0x102   : > { %v2280_v39 = vpack.i.bf16 %v652_v37, %v649_v33 }
 0x103   : > { %v2275_v24 = vpack.i.bf16 %v653_v38, %v650_v35 }
 0x104   : > { %2296 = vrot.lane.b32.xlu1 %v2295_v29, %s2462_s27 }
 0x105   : > { %2276 = vrot.lane.b32.xlu0 %v2275_v24, %s2461_s26 }
 0x108   : > { %2306 = vrot.lane.b32.xlu1 %v2305_v23, %s2465_s28 }
 0x109   : > { %2281 = vrot.lane.b32.xlu0 %v2280_v39, %s2461_s26  ;;  %v2419_v39 = vld [vmem:[%s2885_s6 + $0x8] sm:$0xff]  }
 0x10c   : > { %2316 = vrot.lane.b32.xlu1 %v2285_v32, %s2466_s29 }
 0x10d   : > { %2291 = vrot.lane.b32.xlu0 %v2305_v23, %s2462_s27 }
 0x110   : > { %2326 = vrot.lane.b32.xlu1 %v2295_v29, %s2466_s29 }
 0x111   : > { %2301 = vrot.lane.b32.xlu0 %v2285_v32, %s2465_s28 }
 0x114   : > { %2336 = vrot.lane.b32.xlu1 %v2305_v23, %s2461_s26 }
 0x115   : > { %2311 = vrot.lane.b32.xlu0 %v2295_v29, %s2465_s28 }
 0x118   : > { %2346 = vrot.lane.b32.xlu1 %v2285_v32, %s2467_s30 }
 0x119   : > { %2321 = vrot.lane.b32.xlu0 %v2305_v23, %s2466_s29 }
 0x11c   : > { %2356 = vrot.lane.b32.xlu1 %v2295_v29, %s2467_s30 }
 0x11d   : > { %2331 = vrot.lane.b32.xlu0 %v2285_v32, %s2461_s26 }
 0x120   : > { %2366 = vrot.lane.b32.xlu1 %v2305_v23, %s2468_s12 }
 0x121   : > { %2341 = vrot.lane.b32.xlu0 %v2295_v29, %s2461_s26 }
 0x124   : > { %2376 = vrot.lane.b32.xlu1 %v2285_v32, %s2469_s13 }
 0x125   : > { %2351 = vrot.lane.b32.xlu0 %v2305_v23, %s2467_s30  ;;  %s2248_s30 = smul.u32 48, %s2892_s5 }
 0x128   : > { %2386 = vrot.lane.b32.xlu1 %v2295_v29, %s2469_s13 }
 0x129   : > { %2361 = vrot.lane.b32.xlu0 %v2285_v32, %s2468_s12 }
 0x12c   : > { %2396 = vrot.lane.b32.xlu1 %v2305_v23, %s2470_s14 }
 0x12d   : > { %2371 = vrot.lane.b32.xlu0 %v2295_v29, %s2468_s12 }
 0x130   : > { %708 = vperm.xlu1 %2269, %v704_v42  }
 0x131   : > { %2381 = vrot.lane.b32.xlu0 %v2305_v23, %s2469_s13  ;;  %s386_s13 = scalar_lea.vmem %s2890_s11, %s2248_s30 }
 0x134   : > { %1921 = vperm.xlu1 %2269, %v1917_v43  }
 0x135   : > { %2391 = vrot.lane.b32.xlu0 %v2285_v32, %s2470_s14 }
 0x138   : > { %1939 = vperm.xlu1 %2269, %v1935_v44  }
 0x139   : > { %2401 = vrot.lane.b32.xlu0 %v2295_v29, %s2470_s14 }
 0x13d   : > { %713 = vperm.xlu0 %2268, %v705_v45  }
 0x141   : > { %1926 = vperm.xlu0 %2268, %v1918_v46  }
 0x145   : > { %1944 = vperm.xlu0 %2268, %v1936_v47   ;;  %v2420_v47 = vld [vmem:[%s2885_s6] sm:$0xff]  }
 0x16e   : > { %v2272_v48 = vpop.permute.xlu1 %2271 }
 0x16f   : > { %v2274_v52 = vunpack.i.h.bf16 %v2272_v48  ;;  %v2273_v53 = vunpack.i.l.bf16 %v2272_v48 }
 0x172   : > { %v2287_v50 = vpop.permute.xlu1 %2286 }
 0x173   : > { %v2289_v5 = vunpack.i.h.bf16 %v2287_v50  ;;  %v2288_v6 = vunpack.i.l.bf16 %v2287_v50 }
 0x176   : > { %v2297_v56 = vpop.permute.xlu1 %2296 }
 0x177   : > { %v2277_v51 = vpop.permute.xlu0 %2276  ;;  %v2299_v62 = vunpack.i.h.bf16 %v2297_v56  ;;  %v2298_v63 = vunpack.i.l.bf16 %v2297_v56 }
 0x178   : > { %v2279_v54 = vunpack.i.h.bf16 %v2277_v51  ;;  %v2278_v55 = vunpack.i.l.bf16 %v2277_v51 }
 0x179   : > { %v871_v19 = vsel %vm868_vm4, %v2298_v63, %v2288_v6  ;;  %v872_v20 = vsel %vm868_vm4, %v2299_v62, %v2289_v5 }
 0x17a   : > { %v693_v57 = vsel %vm692_vm3, %v2278_v55, %v2273_v53  ;;  %v694_v58 = vsel %vm692_vm3, %v2279_v54, %v2274_v52  ;;  %v877_v23 = vpack.c.bf16 %v872_v20, %v871_v19  ;;  %v2307_v33 = vpop.permute.xlu1 %2306 }
 0x17b   : > { %v2282_v59 = vpop.permute.xlu0 %2281  ;;  %v702_v60 = vpack.c.bf16 %v694_v58, %v693_v57  ;;  %v2309_v36 = vunpack.i.h.bf16 %v2307_v33  ;;  %v2308_v37 = vunpack.i.l.bf16 %v2307_v33 }
 0x17c   : > { %v2284_v61 = vunpack.i.h.bf16 %v2282_v59  ;;  %v2283_v27 = vunpack.i.l.bf16 %v2282_v59 }
 0x17d   : > { %725 = vmatprep.subr.bf16.mxu1 %v702_v60 }
 0x17e   : > { %v698_v0 = vsel %vm692_vm3, %v2274_v52, %v2284_v61  ;;  %v695_v2 = vsel %vm692_vm3, %v2283_v27, %v2278_v55  ;;  %v696_v3 = vsel %vm692_vm3, %v2284_v61, %v2279_v54  ;;  %v697_v4 = vsel %vm692_vm3, %v2273_v53, %v2283_v27 }
 0x17f   : > { %v701_v8 = vpack.c.bf16 %v696_v3, %v695_v2  ;;  %v703_v9 = vpack.c.bf16 %v698_v0, %v697_v4  ;;  %v2292_v10 = vpop.permute.xlu0 %2291  ;;  %v2421_v4 = vld [vmem:[%s2885_s6 + $0x10] sm:$0xff]  }
 0x180   : > { %v2294_v13 = vunpack.i.h.bf16 %v2292_v10  ;;  %v2293_v14 = vunpack.i.l.bf16 %v2292_v10 }
 0x181   : > { %726 = vmatpush1.bf16.msra.mxu1 %v701_v8  ;;  %2123 = vmatpush3.bf16.msra.mxu0 %v703_v9 }
 0x182   : > { %v874_v21 = vsel %vm868_vm4, %v2294_v13, %v2299_v62  ;;  %v873_v22 = vsel %vm868_vm4, %v2293_v14, %v2298_v63  ;;  %2128 = vmatprep.subr.bf16.mxu0 %v2463_v41  ;;  %v869_v28 = vsel %vm868_vm4, %v2288_v6, %v2293_v14  ;;  %v870_v29 = vsel %vm868_vm4, %v2289_v5, %v2294_v13 }
 0x183   : > { %v879_v30 = vpack.c.bf16 %v874_v21, %v873_v22  ;;  %v2302_v31 = vpop.permute.xlu0 %2301  ;;  %v878_v32 = vpack.c.bf16 %v870_v29, %v869_v28 }
 0x184   : > { %2050 = vmatmul.mubr.msk.bf16.vlgmr.msra.gmra.mrb[4].mxu1 %vm721_vm5, %v2418_v15  ;;  %2125 = vmatmul.mubr.msk.bf16.vlgmr.msra.gmra.mrb[8].mxu0 %vm721_vm5, %v2418_v15  ;;  %v2304_v34 = vunpack.i.h.bf16 %v2302_v31  ;;  %v2303_v35 = vunpack.i.l.bf16 %v2302_v31 }
 0x185   : > { %888 = vmatprep.subr.bf16.mxu1 %v878_v32  ;;  %2129 = vmatpush3.bf16.msra.mxu0 %v879_v30 }
 0x186   : > { %889 = vmatpush1.bf16.msra.mxu1 %v877_v23  ;;  %920 = vmatprep.mubr.bf16.mxu1 %v2460_v1  ;;  %v1077_v24 = vsel %vm1076_vm6, %v2303_v35, %v2308_v37  ;;  %v1078_v42 = vsel %vm1076_vm6, %v2304_v34, %v2309_v36  ;;  %v2422_v23 = vld [vmem:[%s2885_s6 + $0x18] sm:$0xff]  }
 0x187   : > { %980 = vmatprep.subr.bf16.mxu1 %v854_v25  ;;  %2130 = vmatprep.mubr.msk.bf16.mxu0 %vm2464_vm2, %v2463_v41  ;;  %v2312_v38 = vpop.permute.xlu0 %2311  ;;  %v1086_v16 = vpack.c.bf16 %v1078_v42, %v1077_v24  ;;  %v2317_v25 = vpop.permute.xlu1 %2316 }
 0x188   : > { %2134 = vmatprep.subr.bf16.mxu0 %v2463_v41  ;;  %v2314_v43 = vunpack.i.h.bf16 %v2312_v38  ;;  %v2313_v44 = vunpack.i.l.bf16 %v2312_v38  ;;  %v2319_v11 = vunpack.i.h.bf16 %v2317_v25  ;;  %v2318_v12 = vunpack.i.l.bf16 %v2317_v25 }
 0x18a   : > { %v1082_v7 = vsel %vm1076_vm6, %v2309_v36, %v2314_v43  ;;  %v1079_v18 = vsel %vm1076_vm6, %v2313_v44, %v2303_v35 }
 0x18b   : > { %v2322_v17 = vpop.permute.xlu0 %2321  ;;  %v2327_v51 = vpop.permute.xlu1 %2326 }
 0x18c   : > { %2059 = vmatmul.mubr.msk.bf16.vlgmr.msra.gmra.mrb[8].mxu1 %vm721_vm5, %v2419_v39  ;;  %2131 = vmatmul.mubr.msk.bf16.vlgmr.msra.gmra.mrb[12].mxu0 %vm721_vm5, %v2419_v39  ;;  %v2324_v45 = vunpack.i.h.bf16 %v2322_v17  ;;  %v2323_v46 = vunpack.i.l.bf16 %v2322_v17  ;;  %v2329_v56 = vunpack.i.h.bf16 %v2327_v51  ;;  %v2328_v57 = vunpack.i.l.bf16 %v2327_v51 }
 0x18d   : > { %981 = vmatpush1.bf16.msra.mxu1 %v853_v40  ;;  %2135 = vmatpush3.bf16.msra.mxu0 %v855_v26  ;;  %v1080_v40 = vsel %vm1076_vm6, %v2314_v43, %v2304_v34  ;;  %v1081_v26 = vsel %vm1076_vm6, %v2308_v37, %v2313_v44 }
 0x18e   : > { %1096 = vmatprep.subr.bf16.mxu1 %v1086_v16  ;;  %1012 = vmatprep.mubr.bf16.mxu1 %v2460_v1  ;;  %v1199_v48 = vsel %vm1198_vm7, %v2318_v12, %v2323_v46  ;;  %v1200_v50 = vsel %vm1198_vm7, %v2319_v11, %v2324_v45  ;;  %v1085_v52 = vpack.c.bf16 %v1080_v40, %v1079_v18  ;;  %v2423_v18 = vld [vmem:[%s2885_s6 + $0x20] sm:$0xff]  }
 0x18f   : > { %2136 = vmatprep.mubr.msk.bf16.mxu0 %vm2464_vm2, %v2463_v41  ;;  %2140 = vmatprep.subr.bf16.mxu0 %v2463_v41  ;;  %v1087_v53 = vpack.c.bf16 %v1082_v7, %v1081_v26  ;;  %v1208_v54 = vpack.c.bf16 %v1200_v50, %v1199_v48  ;;  %v2332_v55 = vpop.permute.xlu0 %2331  ;;  %v2337_v58 = vpop.permute.xlu1 %2336  ;;  %v1201_v62 = vsel %vm1198_vm7, %v2328_v57, %v2318_v12 }
 0x190   : > { %v2334_v59 = vunpack.i.h.bf16 %v2332_v55  ;;  %v2333_v60 = vunpack.i.l.bf16 %v2332_v55  ;;  %v2339_v61 = vunpack.i.h.bf16 %v2337_v58  ;;  %v2338_v27 = vunpack.i.l.bf16 %v2337_v58 }
 0x191   : > { %v1202_v63 = vsel %vm1198_vm7, %v2329_v56, %v2319_v11  ;;  %v1204_v0 = vsel %vm1198_vm7, %v2324_v45, %v2329_v56  ;;  %v1203_v2 = vsel %vm1198_vm7, %v2323_v46, %v2328_v57 }
 0x192   : > { %v1320_v5 = vsel %vm692_vm3, %v2333_v60, %v2338_v27  ;;  %v1321_v6 = vsel %vm692_vm3, %v2334_v59, %v2339_v61  ;;  %v1207_v8 = vpack.c.bf16 %v1202_v63, %v1201_v62  ;;  %v1209_v9 = vpack.c.bf16 %v1204_v0, %v1203_v2  ;;  %v2424_v62 = vld [vmem:[%s2885_s6 + $0x28] sm:$0xff]  }
 0x193   : > { %v2342_v3 = vpop.permute.xlu0 %2341  ;;  %v1329_v10 = vpack.c.bf16 %v1321_v6, %v1320_v5  ;;  %v2347_v14 = vpop.permute.xlu1 %2346 }
 0x194   : > { %v2344_v15 = vunpack.i.h.bf16 %v2342_v3  ;;  %v2343_v19 = vunpack.i.l.bf16 %v2342_v3  ;;  %v2349_v22 = vunpack.i.h.bf16 %v2347_v14  ;;  %v2348_v28 = vunpack.i.l.bf16 %v2347_v14 }
 0x196   : > { %v1325_v29 = vsel %vm692_vm3, %v2339_v61, %v2344_v15  ;;  %v1322_v30 = vsel %vm692_vm3, %v2343_v19, %v2333_v60  ;;  %v1323_v31 = vsel %vm692_vm3, %v2344_v15, %v2334_v59  ;;  %v1324_v32 = vsel %vm692_vm3, %v2338_v27, %v2343_v19 }
 0x197   : > { %v2352_v13 = vpop.permute.xlu0 %2351  ;;  %v2357_v35 = vpop.permute.xlu1 %2356  ;;  %v1328_v36 = vpack.c.bf16 %v1323_v31, %v1322_v30  ;;  %v1330_v37 = vpack.c.bf16 %v1325_v29, %v1324_v32  ;;  %v2425_v29 = vld [vmem:[%s2885_s6 + $0x30] sm:$0xff]  }
 0x198   : > { %2062 = vmatmul.mubr.msk.bf16.vlgmr.msra.gmra.mrb[8].mxu1 %vm721_vm5, %v2420_v47  ;;  %2137 = vmatmul.mubr.msk.bf16.vlgmr.msra.gmra.mrb[12].mxu0 %vm721_vm5, %v2420_v47  ;;  %v2354_v20 = vunpack.i.h.bf16 %v2352_v13  ;;  %v2353_v21 = vunpack.i.l.bf16 %v2352_v13  ;;  %v2359_v24 = vunpack.i.h.bf16 %v2357_v35  ;;  %v2358_v42 = vunpack.i.l.bf16 %v2357_v35 }
 0x199   : > { %1097 = vmatpush1.bf16.msra.mxu1 %v1085_v52  ;;  %2141 = vmatpush3.bf16.msra.mxu0 %v1087_v53 }
 0x19a   : > { %1218 = vmatprep.subr.bf16.mxu1 %v1208_v54  ;;  %1128 = vmatprep.mubr.bf16.mxu1 %v2460_v1  ;;  %v1442_v33 = vsel %vm1441_vm8, %v2348_v28, %v2353_v21  ;;  %v1443_v34 = vsel %vm1441_vm8, %v2349_v22, %v2354_v20  ;;  %v1444_v45 = vsel %vm1441_vm8, %v2358_v42, %v2348_v28 }
 0x19b   : > { %2142 = vmatprep.mubr.msk.bf16.mxu0 %vm2464_vm2, %v2463_v41  ;;  %2146 = vmatprep.subr.bf16.mxu0 %v2463_v41  ;;  %v1451_v38 = vpack.c.bf16 %v1443_v34, %v1442_v33  ;;  %v2362_v39 = vpop.permute.xlu0 %2361  ;;  %v2367_v16 = vpop.permute.xlu1 %2366  ;;  %v1445_v46 = vsel %vm1441_vm8, %v2359_v24, %v2349_v22  ;;  %v1447_v11 = vsel %vm1441_vm8, %v2354_v20, %v2359_v24 }
 0x19c   : > { %v2364_v17 = vunpack.i.h.bf16 %v2362_v39  ;;  %v2363_v25 = vunpack.i.l.bf16 %v2362_v39  ;;  %v2369_v43 = vunpack.i.h.bf16 %v2367_v16  ;;  %v2368_v44 = vunpack.i.l.bf16 %v2367_v16 }
 0x19d   : > { %v1446_v12 = vsel %vm1441_vm8, %v2353_v21, %v2358_v42  ;;  %v1450_v47 = vpack.c.bf16 %v1445_v46, %v1444_v45  ;;  %v2426_v42 = vld [vmem:[%s2885_s6 + $0x38] sm:$0xff]  }
 0x19e   : > { %v1564_v40 = vsel %vm1563_vm9, %v2363_v25, %v2368_v44  ;;  %v1565_v26 = vsel %vm1563_vm9, %v2364_v17, %v2369_v43  ;;  %v1452_v48 = vpack.c.bf16 %v1447_v11, %v1446_v12 }
 0x19f   : > { %v2372_v7 = vpop.permute.xlu0 %2371  ;;  %v1573_v50 = vpack.c.bf16 %v1565_v26, %v1564_v40  ;;  %v2377_v52 = vpop.permute.xlu1 %2376 }
 0x1a0   : > { %v2374_v53 = vunpack.i.h.bf16 %v2372_v7  ;;  %v2373_v54 = vunpack.i.l.bf16 %v2372_v7  ;;  %v2379_v57 = vunpack.i.h.bf16 %v2377_v52  ;;  %v2378_v58 = vunpack.i.l.bf16 %v2377_v52 }
 0x1a2   : > { %v1569_v59 = vsel %vm1563_vm9, %v2369_v43, %v2374_v53  ;;  %v1566_v60 = vsel %vm1563_vm9, %v2373_v54, %v2363_v25  ;;  %v1567_v61 = vsel %vm1563_vm9, %v2374_v53, %v2364_v17  ;;  %v1568_v27 = vsel %vm1563_vm9, %v2368_v44, %v2373_v54 }
 0x1a3   : > { %v2382_v51 = vpop.permute.xlu0 %2381  ;;  %v2387_v2 = vpop.permute.xlu1 %2386  ;;  %v1572_v3 = vpack.c.bf16 %v1567_v61, %v1566_v60 }
 0x1a4   : > { %2065 = vmatmul.mubr.msk.bf16.vlgmr.msra.gmra.mrb[8].mxu1 %vm721_vm5, %v2421_v4  ;;  %2143 = vmatmul.mubr.msk.bf16.vlgmr.msra.gmra.mrb[12].mxu0 %vm721_vm5, %v2421_v4  ;;  %v2384_v55 = vunpack.i.h.bf16 %v2382_v51  ;;  %v2383_v56 = vunpack.i.l.bf16 %v2382_v51  ;;  %v1574_v4 = vpack.c.bf16 %v1569_v59, %v1568_v27 }
 0x1a5   : > { %1219 = vmatpush1.bf16.msra.mxu1 %v1207_v8  ;;  %2147 = vmatpush3.bf16.msra.mxu0 %v1209_v9  ;;  %v2389_v8 = vunpack.i.h.bf16 %v2387_v2  ;;  %v2388_v9 = vunpack.i.l.bf16 %v2387_v2 }
 0x1a6   : > { %1339 = vmatprep.subr.bf16.mxu1 %v1329_v10  ;;  %1250 = vmatprep.mubr.bf16.mxu1 %v2460_v1  ;;  %v1686_v63 = vsel %vm1685_vm10, %v2378_v58, %v2383_v56  ;;  %v1687_v0 = vsel %vm1685_vm10, %v2379_v57, %v2384_v55 }
 0x1a7   : > { %2148 = vmatprep.mubr.msk.bf16.mxu0 %vm2464_vm2, %v2463_v41  ;;  %2152 = vmatprep.subr.bf16.mxu0 %v2463_v41  ;;  %v1695_v5 = vpack.c.bf16 %v1687_v0, %v1686_v63  ;;  %v2392_v6 = vpop.permute.xlu0 %2391  ;;  %v2397_v10 = vpop.permute.xlu1 %2396  ;;  %v1688_v20 = vsel %vm1685_vm10, %v2388_v9, %v2378_v58  ;;  %v1689_v21 = vsel %vm1685_vm10, %v2389_v8, %v2379_v57 }
 0x1a8   : > { %v2394_v13 = vunpack.i.h.bf16 %v2392_v6  ;;  %v2393_v14 = vunpack.i.l.bf16 %v2392_v6  ;;  %v2399_v15 = vunpack.i.h.bf16 %v2397_v10  ;;  %v2398_v19 = vunpack.i.l.bf16 %v2397_v10 }
 0x1a9   : > { %v1691_v22 = vsel %vm1685_vm10, %v2384_v55, %v2389_v8  ;;  %v1690_v28 = vsel %vm1685_vm10, %v2383_v56, %v2388_v9  ;;  %v1694_v32 = vpack.c.bf16 %v1689_v21, %v1688_v20 }
 0x1aa   : > { %v1808_v30 = vsel %vm1807_vm11, %v2393_v14, %v2398_v19  ;;  %v1809_v31 = vsel %vm1807_vm11, %v2394_v13, %v2399_v15 }
 0x1ab   : > { %v1817_v33 = vpack.c.bf16 %v1809_v31, %v1808_v30  ;;  %v2402_v34 = vpop.permute.xlu0 %2401 }
 0x1ac   : > { %v2404_v35 = vunpack.i.h.bf16 %v2402_v34 }
 0x1ae   : > { %v1811_v39 = vsel %vm1807_vm11, %v2404_v35, %v2394_v13 }
 0x1b0   : > { %2068 = vmatmul.mubr.msk.bf16.vlgmr.msra.gmra.mrb[8].mxu1 %vm721_vm5, %v2422_v23  ;;  %2149 = vmatmul.mubr.msk.bf16.vlgmr.msra.gmra.mrb[12].mxu0 %vm721_vm5, %v2422_v23  ;;  %v1696_v23 = vpack.c.bf16 %v1691_v22, %v1690_v28 }
 0x1b1   : > { %1340 = vmatpush1.bf16.msra.mxu1 %v1328_v36  ;;  %2153 = vmatpush3.bf16.msra.mxu0 %v1330_v37  ;;  %v2403_v36 = vunpack.i.l.bf16 %v2402_v34  ;;  %v1813_v37 = vsel %vm1807_vm11, %v2399_v15, %v2404_v35 }
 0x1b2   : > { %1461 = vmatprep.subr.bf16.mxu1 %v1451_v38  ;;  %1371 = vmatprep.mubr.bf16.mxu1 %v2460_v1 }
 0x1b3   : > { %2154 = vmatprep.mubr.msk.bf16.mxu0 %vm2464_vm2, %v2463_v41  ;;  %2158 = vmatprep.subr.bf16.mxu0 %v2463_v41  ;;  %v1810_v38 = vsel %vm1807_vm11, %v2403_v36, %v2393_v14  ;;  %v1812_v24 = vsel %vm1807_vm11, %v2398_v19, %v2403_v36 }
 0x1b4   : > { %v1816_v16 = vpack.c.bf16 %v1811_v39, %v1810_v38  ;;  %v1818_v17 = vpack.c.bf16 %v1813_v37, %v1812_v24 }
 0x1bc   : > { %2071 = vmatmul.mubr.msk.bf16.vlgmr.msra.gmra.mrb[8].mxu1 %vm721_vm5, %v2423_v18  ;;  %2155 = vmatmul.mubr.msk.bf16.vlgmr.msra.gmra.mrb[12].mxu0 %vm721_vm5, %v2423_v18 }
 0x1bd   : > { %1462 = vmatpush1.bf16.msra.mxu1 %v1450_v47  ;;  %2159 = vmatpush3.bf16.msra.mxu0 %v1452_v48 }
 0x1be   : > { %1583 = vmatprep.subr.bf16.mxu1 %v1573_v50  ;;  %1493 = vmatprep.mubr.bf16.mxu1 %v2460_v1 }
 0x1bf   : > { %2160 = vmatprep.mubr.msk.bf16.mxu0 %vm2464_vm2, %v2463_v41  ;;  %2164 = vmatprep.subr.bf16.mxu0 %v2463_v41 }
 0x1c8   : > { %2074 = vmatmul.mubr.msk.bf16.vlgmr.msra.gmra.mrb[8].mxu1 %vm721_vm5, %v2424_v62  ;;  %2161 = vmatmul.mubr.msk.bf16.vlgmr.msra.gmra.mrb[12].mxu0 %vm721_vm5, %v2424_v62 }
 0x1c9   : > { %1584 = vmatpush1.bf16.msra.mxu1 %v1572_v3  ;;  %2165 = vmatpush3.bf16.msra.mxu0 %v1574_v4 }
 0x1ca   : > { %1705 = vmatprep.subr.bf16.mxu1 %v1695_v5  ;;  %1615 = vmatprep.mubr.bf16.mxu1 %v2460_v1 }
 0x1cb   : > { %2166 = vmatprep.mubr.msk.bf16.mxu0 %vm2464_vm2, %v2463_v41  ;;  %2170 = vmatprep.subr.bf16.mxu0 %v2463_v41 }
 0x1d4   : > { %2077 = vmatmul.mubr.msk.bf16.vlgmr.msra.gmra.mrb[8].mxu1 %vm721_vm5, %v2425_v29  ;;  %2167 = vmatmul.mubr.msk.bf16.vlgmr.msra.gmra.mrb[12].mxu0 %vm721_vm5, %v2425_v29 }
 0x1d5   : > { %1706 = vmatpush1.bf16.msra.mxu1 %v1694_v32  ;;  %2171 = vmatpush3.bf16.msra.mxu0 %v1696_v23 }
 0x1d6   : > { %1827 = vmatprep.subr.bf16.mxu1 %v1817_v33  ;;  %1737 = vmatprep.mubr.bf16.mxu1 %v2460_v1 }
 0x1d7   : > { %2172 = vmatprep.mubr.msk.bf16.mxu0 %vm2464_vm2, %v2463_v41  ;;  %2176 = vmatprep.subr.bf16.mxu0 %v2463_v41 }
 0x1e0   : > { %2080 = vmatmul.mubr.msk.bf16.vlgmr.msra.gmra.mrb[8].mxu1 %vm721_vm5, %v2426_v42  ;;  %2173 = vmatmul.mubr.msk.bf16.vlgmr.msra.gmra.mrb[12].mxu0 %vm721_vm5, %v2426_v42 }
 0x1e1   : > { %1828 = vmatpush1.bf16.msra.mxu1 %v1816_v16  ;;  %2177 = vmatpush3.bf16.msra.mxu0 %v1818_v17 }
 0x1e2   : > { %1859 = vmatprep.mubr.bf16.mxu1 %v2460_v1  ;;  %2178 = vmatprep.mubr.msk.bf16.mxu0 %vm2464_vm2, %v2463_v41  ;;  %v709_v1 = vpop.permute.xlu1 %708  ;;  %v714_v41 = vpop.permute.xlu0 %713 }
 0x1e6   : > { %v1922_v5 = vpop.permute.xlu1 %1921  ;;  %v1927_v6 = vpop.permute.xlu0 %1926 }
 0x1ea   : > { %v1940_v9 = vpop.permute.xlu1 %1939  ;;  %v1945_v39 = vpop.permute.xlu0 %1944 }
 0x1ec   : > { %2083 = vmatmul.mubr.msk.bf16.vlgmr.msra.gmra.mrb[8].mxu1 %vm721_vm5, %v2427_v49  ;;  %2179 = vmatmul.mubr.msk.bf16.vlgmr.msra.gmra.mrb[12].mxu0 %vm721_vm5, %v2427_v49 }
 0x257   : > { %v759_v25 = vpop.f32.mrb[4].mxu1  ;;  %v802_v43 = vpop.f32.mrb[8].mxu0 }
 0x258   : > { %v761_v44 = vpop.f32.mrb[5].mxu1  ;;  %v2126_v45 = vpop.f32.mrb[9].mxu0  ;;  %v760_v18 = vadd.f32 %v759_v25, %v709_v1  ;;  %v803_v40 = vadd.f32 %v802_v43, %v709_v1 }
 0x259   : > { %v763_v46 = vpop.f32.mrb[6].mxu1  ;;  %v805_v11 = vpop.f32.mrb[10].mxu0  ;;  %v762_v26 = vadd.f32 %v761_v44, %v709_v1 }
 0x25a   : > { %v765_v12 = vpop.f32.mrb[7].mxu1  ;;  %v2127_v7 = vpop.f32.mrb[11].mxu0  ;;  %v764_v47 = vadd.f32 %v763_v46, %v714_v41  ;;  %v2052_v48 = vmul.f32 -1.442695, %v760_v18  ;;  %v806_v50 = vadd.f32 %v805_v11, %v714_v41  ;;  %v2054_v51 = vmul.f32 -1.442695, %v803_v40 }
 0x25b   : > { %v2053_v52 = vmul.f32 -1.442695, %v762_v26  ;;  %v766_v53 = vadd.f32 %v765_v12, %v714_v41 }
 0x25c   : > { %v2055_v54 = vmul.f32 -1.442695, %v764_v47  ;;  %2428 = vpow2.f32 %v2052_v48  ;;  %v2057_v55 = vmul.f32 -1.442695, %v806_v50 }
 0x25d   : > { %2430 = vpow2.f32 %v2054_v51  ;;  %v2056_v56 = vmul.f32 -1.442695, %v766_v53 }
 0x25e   : > { %2432 = vpow2.f32 %v2053_v52 }
 0x25f   : > { %2434 = vpow2.f32 %v2055_v54 }
 0x260   : > { %2436 = vpow2.f32 %v2057_v55 }
 0x261   : > { %2438 = vpow2.f32 %v2056_v56 }
 0x266   : > { %v2429_v57 = vpop.eup %2428 }
 0x267   : > { %v2431_v58 = vpop.eup %2430  ;;  %v827_v61 = vadd.f32 1.0, %v2429_v57 }
 0x268   : > { %v2433_v59 = vpop.eup %2432  ;;  %v829_v62 = vadd.f32 1.0, %v2431_v58 }
 0x269   : > { %v2435_v60 = vpop.eup %2434  ;;  %v828_v63 = vadd.f32 1.0, %v2433_v59  ;;  %2440 = vrcp.f32 %v827_v61 }
 0x26a   : > { %v2437_v27 = vpop.eup %2436  ;;  %v830_v2 = vadd.f32 1.0, %v2435_v60  ;;  %2442 = vrcp.f32 %v829_v62 }
 0x26b   : > { %v2439_v0 = vpop.eup %2438  ;;  %v832_v3 = vadd.f32 1.0, %v2437_v27  ;;  %2444 = vrcp.f32 %v828_v63 }
 0x26c   : > { %v831_v4 = vadd.f32 1.0, %v2439_v0  ;;  %2446 = vrcp.f32 %v830_v2 }
 0x26d   : > { %2448 = vrcp.f32 %v832_v3 }
 0x26e   : > { %2450 = vrcp.f32 %v831_v4 }
 0x273   : > { %v2441_v8 = vpop.eup %2440 }
 0x274   : > { %v2443_v10 = vpop.eup %2442  ;;  %v845_v29 = vadd.f32 1.0, %v2441_v8 }
 0x275   : > { %v2445_v15 = vpop.eup %2444  ;;  %v847_v24 = vadd.f32 1.0, %v2443_v10 }
 0x276   : > { %v2447_v28 = vpop.eup %2446  ;;  %v846_v42 = vadd.f32 1.0, %v2445_v15 }
 0x277   : > { %v2449_v23 = vpop.eup %2448  ;;  %v848_v11 = vadd.f32 1.0, %v2447_v28 }
 0x278   : > { %v2451_v49 = vpop.eup %2450  ;;  %v850_v12 = vadd.f32 1.0, %v2449_v23 }
 0x279   : > { %v849_v47 = vadd.f32 1.0, %v2451_v49 }
 0x2bf   : > { %v1861_v13 = vpop.f32.mrb[8].mxu1  ;;  %v1904_v14 = vpop.f32.mrb[12].mxu0 }
 0x2c0   : > { %v1929_v19 = vmul.f32 %v1922_v5, %v1861_v13  ;;  %v1931_v20 = vmul.f32 %v1922_v5, %v1904_v14  ;;  %v1863_v21 = vpop.f32.mrb[9].mxu1  ;;  %v2180_v22 = vpop.f32.mrb[13].mxu0 }
 0x2c1   : > { %v1930_v30 = vmul.f32 %v1922_v5, %v1863_v21  ;;  %v1865_v31 = vpop.f32.mrb[10].mxu1  ;;  %v1907_v32 = vpop.f32.mrb[14].mxu0 }
 0x2c2   : > { %v1947_v33 = vadd.f32 %v1940_v9, %v1929_v19  ;;  %v1949_v34 = vadd.f32 %v1940_v9, %v1931_v20  ;;  %v1932_v35 = vmul.f32 %v1927_v6, %v1865_v31  ;;  %v1934_v36 = vmul.f32 %v1927_v6, %v1907_v32  ;;  %v1867_v37 = vpop.f32.mrb[11].mxu1  ;;  %v2181_v38 = vpop.f32.mrb[15].mxu0 }
 0x2c3   : > { %v1948_v16 = vadd.f32 %v1940_v9, %v1930_v30  ;;  %v1933_v17 = vmul.f32 %v1927_v6, %v1867_v37 }
 0x2c4   : > { %v1953_v25 = vmax.f32 %v1947_v33, 0.0  ;;  %v1955_v43 = vmax.f32 %v1949_v34, 0.0  ;;  %v1950_v44 = vadd.f32 %v1945_v39, %v1932_v35  ;;  %v1952_v45 = vadd.f32 %v1945_v39, %v1934_v36 }
 0x2c5   : > { %v1954_v46 = vmax.f32 %v1948_v16, 0.0  ;;  %v1951_v7 = vadd.f32 %v1945_v39, %v1933_v17 }
 0x2c6   : > { %v1959_v1 = vmul.f32 %v1953_v25, %v845_v29  ;;  %v1961_v18 = vmul.f32 %v1955_v43, %v847_v24  ;;  %v1956_v40 = vmax.f32 %v1950_v44, 0.0  ;;  %v1958_v41 = vmax.f32 %v1952_v45, 0.0 }
 0x2c7   : > { %v1960_v26 = vmul.f32 %v1954_v46, %v846_v42  ;;  %v1957_v48 = vmax.f32 %v1951_v7, 0.0 }
 0x2c8   : > { %1965 = vst [vmem:[%s386_s13] sm:$0xff] %v1959_v1  ;;  %1967 = vst [vmem:[%s386_s13 + $0x10] sm:$0xff] %v1961_v18  ;;  %v1962_v50 = vmul.f32 %v1956_v40, %v848_v11  ;;  %v1964_v51 = vmul.f32 %v1958_v41, %v850_v12 }
 0x2c9   : > { %1966 = vst [vmem:[%s386_s13 + $0x8] sm:$0xff] %v1960_v26  ;;  %v1963_v52 = vmul.f32 %v1957_v48, %v849_v47 }
 0x2ca   : > { %1968 = vst [vmem:[%s386_s13 + $0x18] sm:$0xff] %v1962_v50  ;;  %1970 = vst [vmem:[%s386_s13 + $0x28] sm:$0xff] %v1964_v51 }
 0x2cb   : > { %1969 = vst [vmem:[%s386_s13 + $0x20] sm:$0xff] %v1963_v52 }
 0x2cc PF: > { %s21_s17 = sadd.s32 1, %s2458_s17  }
 0x2cd   : > { %p18_p4 = scmp.ge.s32.totalorder %s21_s17, 4  }
 0x2cf   :  { %20 = sbr.rel (!%p18_p4) target bundleno = 1 (0x1), region = 94 }

</bundles_post_ra>
